<compile_context>
chip_gen: v5e
topology: v5e:2x2
jax: 0.10.0
libtpu: 0.0.40
codegen_flags: <defaults>
</compile_context>

<pallas_src>
import functools

import jax
import jax.numpy as jnp
from jax.experimental import pallas as pl
from jax.experimental.pallas import tpu as pltpu


def _round_up(x, m):
    return ((x + m - 1) // m) * m


def _vmem_budget_bytes():
    """Scoped-VMEM budget derived from the actual chip, with headroom."""
    cap = 64 * 1024 * 1024  # conservative fallback (v7x-sized)
    try:
        cap = int(pltpu.get_tpu_info().vmem_capacity_bytes)
    except Exception:
        pass
    return max(16 * 1024 * 1024, min(cap - 12 * 1024 * 1024, int(0.85 * cap)))


def _ffn_vmem_estimate(tm, th, e_pad, x_bytes, out_bytes):
    est = (2 * tm * e_pad * x_bytes        # x tiles (double-buffered)
           + 2 * e_pad * th * 2            # W1 tiles (bf16)
           + 2 * th * e_pad * 2            # W2 tiles (bf16)
           + 2 * 8 * th * 4                # b1 tiles (f32, sublane-padded)
           + 2 * 8 * e_pad * 4             # b2 (f32)
           + 2 * tm * e_pad * out_bytes    # output tiles
           + tm * th * 4)                  # h intermediate
    if out_bytes != 4:
        est += tm * e_pad * 4              # f32 accumulator scratch
    return est


def _choose_tiles(m, e_pad, h_pad, x_bytes, out_bytes, budget,
                  tile_m_wish, tile_h_wish):
    """Pick (tile_m, tile_h): tile_h divides H_pad, tile_m minimizes padding,
    and the double-buffered VMEM estimate fits the budget."""
    hq = h_pad // 128
    th_opts = [d * 128 for d in range(hq, 0, -1) if hq % d == 0]  # divisors
    th = next((t for t in th_opts if t <= tile_h_wish), th_opts[-1])

    tm_wish = max(16, tile_m_wish)
    while True:
        nrt = pl.cdiv(m, tm_wish)
        tm = min(_round_up(pl.cdiv(m, nrt), 16), _round_up(m, 16))
        if _ffn_vmem_estimate(tm, th, e_pad, x_bytes, out_bytes) <= budget:
            return tm, th
        smaller_th = next((t for t in th_opts if t < th), None)
        if smaller_th is not None and th > 256:
            th = smaller_th
            continue
        if tm_wish > 128:
            tm_wish //= 2
            continue
        return tm, th  # smallest config; let the compiler try anyway


def _ffn_kernel_f32_out(x_ref, w1_ref, b1_ref, w2_ref, b2_ref, o_ref):
    """One (row-tile, hidden-tile) step; accumulates directly into o_ref."""
    k = pl.program_id(1)
    h = jnp.dot(x_ref[...].astype(jnp.bfloat16), w1_ref[...],
                preferred_element_type=jnp.float32)
    h = jnp.maximum(h + b1_ref[...], 0.0)          # fc1 bias + ReLU in f32
    part = jnp.dot(h.astype(jnp.bfloat16), w2_ref[...],
                   preferred_element_type=jnp.float32)

    @pl.when(k == 0)
    def _():
        o_ref[...] = part + b2_ref[...]            # fc2 bias added exactly once

    @pl.when(k > 0)
    def _():
        o_ref[...] += part


def _ffn_kernel_acc(x_ref, w1_ref, b1_ref, w2_ref, b2_ref, o_ref, acc_ref):
    """Same, with an f32 scratch accumulator for non-f32 output dtypes."""
    k = pl.program_id(1)
    h = jnp.dot(x_ref[...].astype(jnp.bfloat16), w1_ref[...],
                preferred_element_type=jnp.float32)
    h = jnp.maximum(h + b1_ref[...], 0.0)
    part = jnp.dot(h.astype(jnp.bfloat16), w2_ref[...],
                   preferred_element_type=jnp.float32)

    @pl.when(k == 0)
    def _():
        acc_ref[...] = part

    @pl.when(k > 0)
    def _():
        acc_ref[...] += part

    @pl.when(k == pl.num_programs(1) - 1)
    def _():
        o_ref[...] = (acc_ref[...] + b2_ref[...]).astype(o_ref.dtype)


@functools.partial(jax.jit, static_argnames=("tile_m", "tile_h"))
def feed_forward(x, w1p, b1p, w2p, b2p, *, tile_m=None, tile_h=1024):
    """Fused FFN. x: (B, T, n_embd); w*/b* from prepare_ffn_params()."""
    B, T, n_embd = x.shape
    E_pad, H_pad = w1p.shape
    assert w2p.shape == (H_pad, E_pad)
    M = B * T
    out_dtype = x.dtype
    x_bytes = x.dtype.itemsize
    out_bytes = out_dtype.itemsize

    budget = _vmem_budget_bytes()
    if tile_m is None:
        # Bigger row tiles on 128 MiB parts (v5e/v6e); ~512 wish on v7x.
        tile_m = 1024 if budget > 80 * 1024 * 1024 else 512
    tile_h = max(128, tile_h)

    tm, th = _choose_tiles(M, E_pad, H_pad, x_bytes, out_bytes, budget,
                           tile_m, tile_h)
    nrt = pl.cdiv(M, tm)
    M_pad = nrt * tm
    nht = H_pad // th

    # No per-call copy of x unless the shape is actually ragged (zero padding
    # is exact: padded hidden units give ReLU(0)=0, padded E columns hit zero
    # weight rows/cols, padded rows are sliced off at the end).
    x2d = x.reshape(M, n_embd)
    if M_pad != M or E_pad != n_embd:
        x2d = jnp.pad(x2d, ((0, M_pad - M), (0, E_pad - n_embd)))

    f32_out = (out_dtype == jnp.float32)
    kernel = _ffn_kernel_f32_out if f32_out else _ffn_kernel_acc
    scratch = [] if f32_out else [pltpu.VMEM((tm, E_pad), jnp.float32)]

    cost = pl.CostEstimate(
        flops=4 * M_pad * E_pad * H_pad,
        transcendentals=0,
        bytes_accessed=(M_pad * E_pad * (x_bytes + out_bytes)
                        + nrt * 2 * (E_pad * H_pad * 2)   # W1+W2 per row tile
                        + (H_pad + E_pad) * 4))

    out2d = pl.pallas_call(
        kernel,
        out_shape=jax.ShapeDtypeStruct((M_pad, E_pad), out_dtype),
        grid_spec=pltpu.PrefetchScalarGridSpec(
            num_scalar_prefetch=0,
            grid=(nrt, nht),
            in_specs=[
                pl.BlockSpec((tm, E_pad), lambda i, k: (i, 0)),   # x
                pl.BlockSpec((E_pad, th), lambda i, k: (0, k)),   # W1
                pl.BlockSpec((1, th),     lambda i, k: (0, k)),   # b1
                pl.BlockSpec((th, E_pad), lambda i, k: (k, 0)),   # W2
                pl.BlockSpec((1, E_pad),  lambda i, k: (0, 0)),   # b2
            ],
            out_specs=pl.BlockSpec((tm, E_pad), lambda i, k: (i, 0)),
            scratch_shapes=scratch,
        ),
        compiler_params=pltpu.CompilerParams(
            dimension_semantics=("parallel", "arbitrary"),
            vmem_limit_bytes=int(budget)),
        cost_estimate=cost,
    )(x2d, w1p, b1p, w2p, b2p)

    return out2d[:M, :n_embd].reshape(B, T, n_embd)


def init_params(key, n_embd, hidden_dim, dtype=jnp.float32):
    """Matches PyTorch _init_weights: normal(0, 0.02) weights, zero bias.
    Weights stored (in_features, out_features) so the kernel computes x @ W."""
    k1, k2 = jax.random.split(key, 2)
    w1 = 0.02 * jax.random.normal(k1, (n_embd, hidden_dim), dtype)
    b1 = jnp.zeros((hidden_dim,), dtype)
    w2 = 0.02 * jax.random.normal(k2, (hidden_dim, n_embd), dtype)
    b2 = jnp.zeros((n_embd,), dtype)
    return w1, b1, w2, b2


def prepare_ffn_params(w1, b1, w2, b2):
    """One-time pad-to-128-multiple + bf16 cast (hoisted out of the call path)."""
    n_embd, hidden = w1.shape
    E_pad = _round_up(n_embd, 128)
    H_pad = _round_up(hidden, 128)
    w1p = jnp.zeros((E_pad, H_pad), jnp.bfloat16).at[:n_embd, :hidden].set(
        w1.astype(jnp.bfloat16))
    w2p = jnp.zeros((H_pad, E_pad), jnp.bfloat16).at[:hidden, :n_embd].set(
        w2.astype(jnp.bfloat16))
    b1p = jnp.zeros((1, H_pad), jnp.float32).at[0, :hidden].set(
        b1.astype(jnp.float32))
    b2p = jnp.zeros((1, E_pad), jnp.float32).at[0, :n_embd].set(
        b2.astype(jnp.float32))
    return w1p, b1p, w2p, b2p


def ffn_reference(x, w1, b1, w2, b2):
    """Plain-JAX reference mirroring the kernel's bf16-in / f32-acc numerics."""
    B, T, n_embd = x.shape
    x2d = x.reshape(B * T, n_embd).astype(jnp.bfloat16)
    h = jnp.dot(x2d, w1.astype(jnp.bfloat16),
                preferred_element_type=jnp.float32) + b1.astype(jnp.float32)
    h = jnp.maximum(h, 0.0)
    o = jnp.dot(h.astype(jnp.bfloat16), w2.astype(jnp.bfloat16),
                preferred_element_type=jnp.float32) + b2.astype(jnp.float32)
    return o.reshape(B, T, n_embd).astype(x.dtype)


if __name__ == "__main__":
    key = jax.random.PRNGKey(0)

    # Case 1: aligned small shapes, f32 activations (accumulate-into-output).
    B, T, n_embd, hidden_dim = 2, 16, 128, 256
    kx, kp, key = jax.random.split(key, 3)
    x = jax.random.normal(kx, (B, T, n_embd), jnp.float32)
    w1, b1, w2, b2 = init_params(kp, n_embd, hidden_dim)
    params = prepare_ffn_params(w1, b1, w2, b2)
    out = feed_forward(x, *params)
    jax.block_until_ready(out)
    ref = ffn_reference(x, w1, b1, w2, b2)
    assert out.shape == (B, T, n_embd)
    assert jnp.allclose(out, ref, atol=2e-2, rtol=2e-2)

    # Case 2: ragged / unaligned shapes + bf16 activations (scratch-acc path).
    B2, T2, n_embd2, hidden2 = 2, 7, 96, 200
    kx2, kp2, key = jax.random.split(key, 3)
    x2 = jax.random.normal(kx2, (B2, T2, n_embd2), jnp.float32).astype(jnp.bfloat16)
    w1b, b1b, w2b, b2b = init_params(kp2, n_embd2, hidden2)
    params2 = prepare_ffn_params(w1b, b1b, w2b, b2b)
    out2 = feed_forward(x2, *params2)
    jax.block_until_ready(out2)
    ref2 = ffn_reference(x2, w1b, b1b, w2b, b2b)
    assert out2.shape == (B2, T2, n_embd2)
    assert jnp.allclose(out2.astype(jnp.float32), ref2.astype(jnp.float32),
                        atol=5e-2, rtol=5e-2)

    # Case 3: small tile overrides force multiple row and hidden tiles.
    B3, T3, n_embd3, hidden3 = 3, 100, 128, 512
    kx3, kp3, _ = jax.random.split(key, 3)
    x3 = jax.random.normal(kx3, (B3, T3, n_embd3), jnp.float32)
    w1c, b1c, w2c, b2c = init_params(kp3, n_embd3, hidden3)
    params3 = prepare_ffn_params(w1c, b1c, w2c, b2c)
    out3 = feed_forward(x3, *params3, tile_m=128, tile_h=256)
    jax.block_until_ready(out3)
    ref3 = ffn_reference(x3, w1c, b1c, w2c, b2c)
    assert out3.shape == (B3, T3, n_embd3)
    assert jnp.allclose(out3, ref3, atol=2e-2, rtol=2e-2)

    print("KERNEL_OK")
</pallas_src>

<mosaic_0001>
module attributes {stable_mosaic.version = 11 : i64} {
  func.func @_ffn_kernel_f32_out(%arg0: i32, %arg1: i32, %arg2: memref<32x128xf32, #tpu.memory_space<vmem>>, %arg3: memref<128x256xbf16, #tpu.memory_space<vmem>>, %arg4: memref<1x256xf32, #tpu.memory_space<vmem>>, %arg5: memref<256x128xbf16, #tpu.memory_space<vmem>>, %arg6: memref<1x128xf32, #tpu.memory_space<vmem>>, %arg7: memref<32x128xf32, #tpu.memory_space<vmem>>) attributes {dimension_semantics = [#tpu.dimension_semantics<parallel>, #tpu.dimension_semantics<arbitrary>], iteration_bounds = array<i64: 1, 1>, scalar_prefetch = 0 : i64, scratch_operands = 0 : i64, tpu.core_type = #tpu.core_type<tc>, window_params = [{transform_indices = @transform_0, window_bounds = array<i64: 32, 128>}, {transform_indices = @transform_1, window_bounds = array<i64: 128, 256>}, {transform_indices = @transform_2, window_bounds = array<i64: 1, 256>}, {transform_indices = @transform_3, window_bounds = array<i64: 256, 128>}, {pipeline_mode = #tpu.pipeline_mode<synchronous>, transform_indices = @transform_4, window_bounds = array<i64: 1, 128>}, {transform_indices = @transform_5, window_bounds = array<i64: 32, 128>}]} {
    %c0 = arith.constant 0 : index
    %c0_0 = arith.constant 0 : index
    %0 = vector.load %arg2[%c0, %c0_0] : memref<32x128xf32, #tpu.memory_space<vmem>>, vector<32x128xf32>
    %1 = arith.truncf %0 : vector<32x128xf32> to vector<32x128xbf16>
    %c0_1 = arith.constant 0 : index
    %c0_2 = arith.constant 0 : index
    %2 = vector.load %arg3[%c0_1, %c0_2] : memref<128x256xbf16, #tpu.memory_space<vmem>>, vector<128x256xbf16>
    %cst = arith.constant dense<0.000000e+00> : vector<32x256xf32>
    %3 = tpu.matmul %1, %2, %cst {dimension_numbers = #tpu.dot_dimension_numbers<[1], [0], [0], [1], [0, 0, 1, 1], [], []>} : vector<32x128xbf16>, vector<128x256xbf16>, vector<32x256xf32> -> vector<32x256xf32>
    %c0_3 = arith.constant 0 : index
    %c0_4 = arith.constant 0 : index
    %4 = vector.load %arg4[%c0_3, %c0_4] : memref<1x256xf32, #tpu.memory_space<vmem>>, vector<1x256xf32>
    %5 = vector.broadcast %4 : vector<1x256xf32> to vector<32x256xf32>
    %6 = arith.addf %3, %5 : vector<32x256xf32>
    %cst_5 = arith.constant 0.000000e+00 : f32
    %7 = vector.broadcast %cst_5 : f32 to vector<32x256xf32>
    %8 = arith.maximumf %6, %7 : vector<32x256xf32>
    %9 = arith.truncf %8 : vector<32x256xf32> to vector<32x256xbf16>
    %c0_6 = arith.constant 0 : index
    %c0_7 = arith.constant 0 : index
    %10 = vector.load %arg5[%c0_6, %c0_7] : memref<256x128xbf16, #tpu.memory_space<vmem>>, vector<256x128xbf16>
    %cst_8 = arith.constant dense<0.000000e+00> : vector<32x128xf32>
    %11 = tpu.matmul %9, %10, %cst_8 {dimension_numbers = #tpu.dot_dimension_numbers<[1], [0], [0], [1], [0, 0, 1, 1], [], []>} : vector<32x256xbf16>, vector<256x128xbf16>, vector<32x128xf32> -> vector<32x128xf32>
    %c0_i32 = arith.constant 0 : i32
    %12 = arith.cmpi eq, %arg1, %c0_i32 : i32
    %13 = arith.extui %12 : i1 to i32
    %c0_i32_9 = arith.constant 0 : i32
    %14 = arith.cmpi ne, %13, %c0_i32_9 : i32
    scf.if %14 {
      %c0_12 = arith.constant 0 : index
      %c0_13 = arith.constant 0 : index
      %18 = vector.load %arg6[%c0_12, %c0_13] : memref<1x128xf32, #tpu.memory_space<vmem>>, vector<1x128xf32>
      %19 = vector.broadcast %18 : vector<1x128xf32> to vector<32x128xf32>
      %20 = arith.addf %11, %19 : vector<32x128xf32>
      %c0_14 = arith.constant 0 : index
      %c0_15 = arith.constant 0 : index
      %21 = vector.load %arg7[%c0_14, %c0_15] : memref<32x128xf32, #tpu.memory_space<vmem>>, vector<32x128xf32>
      tpu.vector_store %arg7[%c0_14, %c0_15], %20 {strides = array<i32>} : memref<32x128xf32, #tpu.memory_space<vmem>>, vector<32x128xf32>,
    } else {
    }
    %c0_i32_10 = arith.constant 0 : i32
    %15 = arith.cmpi sgt, %arg1, %c0_i32_10 : i32
    %16 = arith.extui %15 : i1 to i32
    %c0_i32_11 = arith.constant 0 : i32
    %17 = arith.cmpi ne, %16, %c0_i32_11 : i32
    scf.if %17 {
      %c0_12 = arith.constant 0 : index
      %c0_13 = arith.constant 0 : index
      %18 = vector.load %arg7[%c0_12, %c0_13] : memref<32x128xf32, #tpu.memory_space<vmem>>, vector<32x128xf32>
      %19 = arith.addf %18, %11 : vector<32x128xf32>
      %c0_14 = arith.constant 0 : index
      %c0_15 = arith.constant 0 : index
      %20 = vector.load %arg7[%c0_14, %c0_15] : memref<32x128xf32, #tpu.memory_space<vmem>>, vector<32x128xf32>
      tpu.vector_store %arg7[%c0_14, %c0_15], %19 {strides = array<i32>} : memref<32x128xf32, #tpu.memory_space<vmem>>, vector<32x128xf32>,
    } else {
    }
    return
  }
  func.func @transform_0(%arg0: i32, %arg1: i32) -> (i32, i32) {
    %c0_i32 = arith.constant 0 : i32
    %c0_i32_0 = arith.constant 0 : i32
    return %arg0, %c0_i32 : i32, i32
  }
  func.func @transform_1(%arg0: i32, %arg1: i32) -> (i32, i32) {
    %c0_i32 = arith.constant 0 : i32
    %c0_i32_0 = arith.constant 0 : i32
    return %c0_i32, %arg1 : i32, i32
  }
  func.func @transform_2(%arg0: i32, %arg1: i32) -> (i32, i32) {
    %c0_i32 = arith.constant 0 : i32
    %c0_i32_0 = arith.constant 0 : i32
    return %c0_i32, %arg1 : i32, i32
  }
  func.func @transform_3(%arg0: i32, %arg1: i32) -> (i32, i32) {
    %c0_i32 = arith.constant 0 : i32
    %c0_i32_0 = arith.constant 0 : i32
    return %arg1, %c0_i32 : i32, i32
  }
  func.func @transform_4(%arg0: i32, %arg1: i32) -> (i32, i32) {
    %c0_i32 = arith.constant 0 : i32
    %c0_i32_0 = arith.constant 0 : i32
    %c0_i32_1 = arith.constant 0 : i32
    return %c0_i32, %c0_i32_0 : i32, i32
  }
  func.func @transform_5(%arg0: i32, %arg1: i32) -> (i32, i32) {
    %c0_i32 = arith.constant 0 : i32
    %c0_i32_0 = arith.constant 0 : i32
    return %arg0, %c0_i32 : i32, i32
  }
}

</mosaic_0001>

<bundles_post_ra>
// kernel: feed_forward.1
= control target key start
LH: loop header
LB: loop body
LE: loop exit
PB: predicated region body
PF: predicated region fallthrough
CT: control target
= control target key end

     0   :  { %10 = vsyncpa [#allocation3], 0  ;;  %s780_s0 = inlined_call_operand.hbm [shape: f32[32,128], index: 0, kind: input, shape index: {}]   ;;  %s781_s1 = inlined_call_operand.hbm [shape: bf16[128,256], index: 1, kind: input, shape index: {}]   ;;  %s782_s2 = inlined_call_operand.vmem [shape: f32[1,256], index: 2, kind: input, shape index: {}]   ;;  %s783_s3 = inlined_call_operand.hbm [shape: bf16[256,128], index: 3, kind: input, shape index: {}]   ;;  %s784_s4 = inlined_call_operand.vmem [shape: f32[1,128], index: 4, kind: input, shape index: {}]   ;;  %s785_s5 = inlined_call_operand.hbm [shape: f32[32,128], index: 5, kind: output, shape index: {}]  }
   0x1   :  { %11 = vsyncpa [#allocation6], 0 }
   0x2   :  { %12 = vsyncpa [#allocation4], 0  ;;  %s30_s20 = sshll.u32 %s781_s1, 4  ;;  %s715_s21 = smov [#allocation5]   ;;  %s31_s20 = int_to_ptr.hbm [resolvable:$true] %s30_s20 }
   0x3   :  { %s32_s22 = sshll.u32 %s715_s21, 4  ;;  %s17_s25 = sshll.u32 %s780_s0, 4  ;;  %s33_s22 = int_to_ptr.vmem [resolvable:$true] %s32_s22  ;;  %s18_s25 = int_to_ptr.hbm [resolvable:$true] %s17_s25 }
   0x4   :  { %s716_s26 = smov 128   ;;  %s717_s27 = smov 8  }
   0x5   :  { %38 = dma.hbm_to_vmem [thread:$0]  %s31_s20, 2048, %s33_s22, [#allocation6], %s716_s26, %s716_s26, %s717_s27  }
   0x6   :  { %s718_s28 = smov [#allocation2]   ;;  %s45_s1 = sshll.u32 %s783_s3, 4  ;;  %s46_s1 = int_to_ptr.hbm [resolvable:$true] %s45_s1 }
   0x7   :  { %s19_s29 = sshll.u32 %s718_s28, 4  ;;  %s719_s0 = smov [#allocation7]   ;;  %s20_s29 = int_to_ptr.vmem [resolvable:$true] %s19_s29 }
   0x8   :  { %25 = dma.hbm_to_vmem [thread:$0]  %s18_s25, 512, %s20_s29, [#allocation3], %s716_s26, %s716_s26, %s717_s27  }
   0x9   :  { %s47_s7 = sshll.u32 %s719_s0, 4  ;;  %s720_s8 = smov 64   ;;  %s48_s7 = int_to_ptr.vmem [resolvable:$true] %s47_s7 }
   0xa   :  { %s721_s9 = smov 4  }
   0xb   :  { %53 = dma.hbm_to_vmem [thread:$0]  %s46_s1, 2048, %s48_s7, [#allocation6], %s720_s8, %s720_s8, %s721_s9  }
   0xc   :  { %709 = dma.done.wait [#allocation3], 512  }
   0xd   :  { %710 = vsyncadd [#allocation3], 4294966784 }
   0xe   :  { %711 = dma.done.wait [#allocation6], 4096  }
   0xf   :  { %712 = vsyncadd [#allocation6], 4294963200  ;;  %v502_v0 = vld [vmem:[#allocation5 + $0x70] sm:$0xf]  ;;  %v587_v1 = vld [vmem:[#allocation5 + $0x74] sm:$0xf0] }
  0x10   :  { %v586_v2 = vld [vmem:[#allocation5 + $0x74] sm:$0xf]  ;;  %v503_v3 = vor.u32 %v587_v1, %v502_v0  ;;  %v504_v4 = vld [vmem:[#allocation5 + $0x78] sm:$0xf0]  ;;  %v494_v5 = vld [vmem:[#allocation5 + $0x60] sm:$0xf] }
  0x11   :  { %v585_v6 = vld [vmem:[#allocation5 + $0x64] sm:$0xf0]  ;;  %v507_v7 = vor.u32 %v586_v2, %v504_v4  ;;  %v584_v8 = vld [vmem:[#allocation5 + $0x64] sm:$0xf]  ;;  %v496_v9 = vld [vmem:[#allocation5 + $0x68] sm:$0xf0] }
  0x12   :  { %176 = vmatpush.bf16.msra.mxu0 %v503_v3  ;;  %v495_v10 = vor.u32 %v585_v6, %v494_v5  ;;  %v499_v11 = vor.u32 %v584_v8, %v496_v9  ;;  %v486_v12 = vld [vmem:[#allocation5 + $0x50] sm:$0xf]  ;;  %v583_v13 = vld [vmem:[#allocation5 + $0x54] sm:$0xf0]  ;;  %v582_v14 = vld [vmem:[#allocation5 + $0x54] sm:$0xf] }
  0x13   :  { %195 = vmatpush.bf16.msra.mxu1 %v507_v7  ;;  %v488_v15 = vld [vmem:[#allocation5 + $0x58] sm:$0xf0]  ;;  %v487_v16 = vor.u32 %v583_v13, %v486_v12  ;;  %v478_v18 = vld [vmem:[#allocation5 + $0x40] sm:$0xf]  ;;  %v581_v19 = vld [vmem:[#allocation5 + $0x44] sm:$0xf0] }
  0x14   :  { %v491_v17 = vor.u32 %v582_v14, %v488_v15  ;;  %v580_v20 = vld [vmem:[#allocation5 + $0x44] sm:$0xf]  ;;  %v480_v21 = vld [vmem:[#allocation5 + $0x48] sm:$0xf0]  ;;  %v479_v22 = vor.u32 %v581_v19, %v478_v18  ;;  %v470_v24 = vld [vmem:[#allocation5 + $0x30] sm:$0xf] }
  0x15   :  { %v483_v23 = vor.u32 %v580_v20, %v480_v21  ;;  %v579_v25 = vld [vmem:[#allocation5 + $0x34] sm:$0xf0]  ;;  %v578_v26 = vld [vmem:[#allocation5 + $0x34] sm:$0xf]  ;;  %v472_v27 = vld [vmem:[#allocation5 + $0x38] sm:$0xf0] }
  0x16   :  { %177 = vmatpush.bf16.msra.mxu0 %v495_v10  ;;  %v471_v28 = vor.u32 %v579_v25, %v470_v24  ;;  %v475_v29 = vor.u32 %v578_v26, %v472_v27  ;;  %v462_v30 = vld [vmem:[#allocation5 + $0x20] sm:$0xf]  ;;  %v577_v31 = vld [vmem:[#allocation5 + $0x24] sm:$0xf0]  ;;  %v576_v32 = vld [vmem:[#allocation5 + $0x24] sm:$0xf] }
  0x17   :  { %196 = vmatpush.bf16.msra.mxu1 %v499_v11  ;;  %v464_v33 = vld [vmem:[#allocation5 + $0x28] sm:$0xf0]  ;;  %v463_v34 = vor.u32 %v577_v31, %v462_v30  ;;  %v595_v35 = vld [vmem:[#allocation7 + $0x38] sm:$0xff]  ;;  %v454_v38 = vld [vmem:[#allocation5 + $0x10] sm:$0xf]  ;;  %s722_s12 = smov [#allocation8]  }
  0x18   :  { %v603_v36 = vld [vmem:[#allocation7 + $0x78] sm:$0xff]  ;;  %v467_v37 = vor.u32 %v576_v32, %v464_v33  ;;  %v574_v40 = vld [vmem:[#allocation5 + $0x14] sm:$0xf]  ;;  %354 = vmatpush.bf16.msra.mxu2 %v595_v35  ;;  %v446_v46 = vld [vmem:[#allocation5] sm:$0xf]  ;;  %s428_s13 = sshll.u32 %s722_s12, 4  ;;  %s429_s13 = int_to_ptr.vmem [resolvable:$true] %s428_s13 }
  0x19   :  { %v575_v39 = vld [vmem:[#allocation5 + $0x14] sm:$0xf0]  ;;  %v456_v41 = vld [vmem:[#allocation5 + $0x18] sm:$0xf0]  ;;  %373 = vmatpush.bf16.msra.mxu3 %v603_v36  ;;  %v594_v42 = vld [vmem:[#allocation7 + $0x30] sm:$0xff]  ;;  %s430_s15 = sshll.u32 %s785_s5, 4  ;;  %s431_s15 = int_to_ptr.hbm [resolvable:$true] %s430_s15 }
  0x1a   :  { %178 = vmatpush.bf16.msra.mxu0 %v487_v16  ;;  %v602_v43 = vld [vmem:[#allocation7 + $0x70] sm:$0xff]  ;;  %v455_v44 = vor.u32 %v575_v39, %v454_v38  ;;  %v459_v45 = vor.u32 %v574_v40, %v456_v41  ;;  %v573_v47 = vld [vmem:[#allocation5 + $0x4] sm:$0xf0]  ;;  %v572_v48 = vld [vmem:[#allocation5 + $0x4] sm:$0xf] }
  0x1b   :  { %197 = vmatpush.bf16.msra.mxu1 %v491_v17  ;;  %v448_v49 = vld [vmem:[#allocation5 + $0x8] sm:$0xf0]  ;;  %v447_v52 = vor.u32 %v573_v47, %v446_v46  ;;  %v68_v53 = vld [vmem:[#allocation2] sm:$0xff]  ;;  %v70_v59 = vld [vmem:[#allocation2 + $0x10] sm:$0xff] }
  0x1c   :  { %355 = vmatpush.bf16.msra.mxu2 %v594_v42  ;;  %v593_v50 = vld [vmem:[#allocation7 + $0x28] sm:$0xff]  ;;  %v451_v55 = vor.u32 %v572_v48, %v448_v49  ;;  %v592_v56 = vld [vmem:[#allocation7 + $0x20] sm:$0xff]  ;;  %v71_v60 = vld [vmem:[#allocation2 + $0x18] sm:$0xff] }
  0x1d   :  { %374 = vmatpush.bf16.msra.mxu3 %v602_v43  ;;  %v601_v51 = vld [vmem:[#allocation7 + $0x68] sm:$0xff]  ;;  %v600_v57 = vld [vmem:[#allocation7 + $0x60] sm:$0xff]  ;;  %v73_v61 = vpack.c.bf16 %v71_v60, %v70_v59  ;;  %v591_v62 = vld [vmem:[#allocation7 + $0x18] sm:$0xff] }
  0x1e   :  { %179 = vmatpush.bf16.msra.mxu0 %v479_v22  ;;  %v69_v54 = vld [vmem:[#allocation2 + $0x8] sm:$0xff]  ;;  %v599_v63 = vld [vmem:[#allocation7 + $0x58] sm:$0xff]  ;;  %v590_v0 = vld [vmem:[#allocation7 + $0x10] sm:$0xff] }
  0x1f   :  { %198 = vmatpush.bf16.msra.mxu1 %v483_v23  ;;  %v72_v58 = vpack.c.bf16 %v69_v54, %v68_v53  ;;  %v598_v1 = vld [vmem:[#allocation7 + $0x50] sm:$0xff]  ;;  %v589_v2 = vld [vmem:[#allocation7 + $0x8] sm:$0xff]  ;;  %v588_v4 = vld [vmem:[#allocation7] sm:$0xff] }
  0x20   :  { %356 = vmatpush.bf16.msra.mxu2 %v593_v50  ;;  %v597_v3 = vld [vmem:[#allocation7 + $0x48] sm:$0xff]  ;;  %v596_v5 = vld [vmem:[#allocation7 + $0x40] sm:$0xff] }
  0x21   :  { %375 = vmatpush.bf16.msra.mxu3 %v601_v51  ;;  %v90_v6 = vld [vmem:[%s782_s2] sm:$0x3] }
  0x22   :  { %180 = vmatpush.bf16.msra.mxu0 %v471_v28  ;;  %v92_v9 = vperm.slane %v90_v6, 0  ;;  %v93_v10 = vperm.slane %v90_v6, 1  ;;  %v612_v38 = vld [vmem:[%s784_s4] ss:$0 sm:$0xff] }
  0x23   :  { %199 = vmatpush.bf16.msra.mxu1 %v475_v29 }
  0x24   :  { %357 = vmatpush.bf16.msra.mxu2 %v592_v56 }
  0x25   :  { %376 = vmatpush.bf16.msra.mxu3 %v600_v57 }
  0x26   :  { %181 = vmatpush.bf16.msra.mxu0 %v463_v34 }
  0x27   :  { %200 = vmatpush.bf16.msra.mxu1 %v467_v37 }
  0x28   :  { %358 = vmatpush.bf16.msra.mxu2 %v591_v62 }
  0x29   :  { %377 = vmatpush.bf16.msra.mxu3 %v599_v63 }
  0x2a   :  { %182 = vmatpush.bf16.msra.mxu0 %v455_v44 }
  0x2b   :  { %201 = vmatpush.bf16.msra.mxu1 %v459_v45 }
  0x2c   :  { %359 = vmatpush.bf16.msra.mxu2 %v590_v0 }
  0x2d   :  { %378 = vmatpush.bf16.msra.mxu3 %v598_v1 }
  0x2e   :  { %183 = vmatpush.bf16.msra.mxu0 %v447_v52 }
  0x2f   :  { %202 = vmatpush.bf16.msra.mxu1 %v451_v55 }
  0x30   :  { %360 = vmatpush.bf16.msra.mxu2 %v589_v2 }
  0x31   :  { %184 = vmatmul.bf16.vlgmr.msra.gmra.mxu0 %v72_v58  ;;  %379 = vmatpush.bf16.msra.mxu3 %v597_v3 }
  0x32   :  { %203 = vmatmul.bf16.vlgmr.msra.gmra.mxu1 %v72_v58 }
  0x34   :  { %361 = vmatpush.bf16.msra.mxu2 %v588_v4 }
  0x35   :  { %380 = vmatpush.bf16.msra.mxu3 %v596_v5 }
  0x41   :  { %189 = vmatmul.bf16.gmra.mxu0 %v73_v61 }
  0x42   :  { %208 = vmatmul.bf16.gmra.mxu1 %v73_v61 }
  0xae   :  { %v185_v7 = vpop.f32.mrf.mxu0 }
  0xaf   :  { %v204_v8 = vpop.f32.mrf.mxu1  ;;  %v186_v11 = vadd.f32 %v185_v7, %v92_v9 }
  0xb0   :  { %v205_v12 = vadd.f32 %v204_v8, %v93_v10 }
  0xb1   :  { %v214_v17 = vmax.f32 %v186_v11, 0.0 }
  0xb2   :  { %v215_v19 = vmax.f32 %v205_v12, 0.0 }
  0xb6   :  { %v187_v13 = vpop.f32.mrf.mxu0 }
  0xb7   :  { %v188_v14 = vadd.f32 %v187_v13, %v92_v9  ;;  %v206_v15 = vpop.f32.mrf.mxu1 }
  0xb8   :  { %v207_v16 = vadd.f32 %v206_v15, %v93_v10 }
  0xb9   :  { %v216_v18 = vmax.f32 %v188_v14, 0.0 }
  0xba   :  { %v217_v20 = vmax.f32 %v207_v16, 0.0 }
  0xbb   :  { %v222_v21 = vpack.c.bf16 %v216_v18, %v214_v17 }
  0xbc   :  { %v223_v22 = vpack.c.bf16 %v217_v20, %v215_v19 }
  0xbd   :  { %362 = vmatmul.bf16.vlgmr.msra.gmra.mxu2 %v222_v21 }
  0xbe   :  { %381 = vmatmul.bf16.vlgmr.msra.gmra.mxu3 %v223_v22  ;;  %v190_v23 = vpop.f32.mrf.mxu0 }
  0xbf   :  { %v209_v24 = vpop.f32.mrf.mxu1  ;;  %v191_v25 = vadd.f32 %v190_v23, %v92_v9 }
  0xc0   :  { %v210_v26 = vadd.f32 %v209_v24, %v93_v10 }
  0xc1   :  { %v218_v31 = vmax.f32 %v191_v25, 0.0 }
  0xc2   :  { %v219_v33 = vmax.f32 %v210_v26, 0.0 }
  0xc6   :  { %v192_v27 = vpop.f32.mrf.mxu0 }
  0xc7   :  { %v193_v28 = vadd.f32 %v192_v27, %v92_v9  ;;  %v211_v29 = vpop.f32.mrf.mxu1 }
  0xc8   :  { %v212_v30 = vadd.f32 %v211_v29, %v93_v10 }
  0xc9   :  { %v220_v32 = vmax.f32 %v193_v28, 0.0 }
  0xca   :  { %v221_v34 = vmax.f32 %v212_v30, 0.0 }
  0xcb   :  { %v224_v35 = vpack.c.bf16 %v220_v32, %v218_v31 }
  0xcc   :  { %v225_v36 = vpack.c.bf16 %v221_v34, %v219_v33 }
  0xcd   :  { %367 = vmatmul.bf16.gmra.mxu2 %v224_v35 }
  0xce   :  { %386 = vmatmul.bf16.gmra.mxu3 %v225_v36 }
 0x140   :  { %v363_v37 = vpop.f32.mrf.mxu2 }
 0x141   :  { %v382_v39 = vpop.f32.mrf.mxu3 }
 0x142   :  { %v383_v40 = vadd.f32 %v382_v39, %v363_v37 }
 0x144   :  { %v400_v41 = vadd.f32 %v612_v38, %v383_v40 }
 0x146   :  { %404 = vst [vmem:[#allocation8] sm:$0xff] %v400_v41 }
 0x148   :  { %v365_v42 = vpop.f32.mrf.mxu2 }
 0x149   :  { %v384_v43 = vpop.f32.mrf.mxu3 }
 0x14a   :  { %v385_v44 = vadd.f32 %v384_v43, %v365_v42 }
 0x14c   :  { %v401_v45 = vadd.f32 %v612_v38, %v385_v44 }
 0x14e   :  { %405 = vst [vmem:[#allocation8 + $0x8] sm:$0xff] %v401_v45 }
 0x150   :  { %v368_v46 = vpop.f32.mrf.mxu2 }
 0x151   :  { %v387_v47 = vpop.f32.mrf.mxu3 }
 0x152   :  { %v388_v48 = vadd.f32 %v387_v47, %v368_v46 }
 0x154   :  { %v402_v49 = vadd.f32 %v612_v38, %v388_v48 }
 0x156   :  { %406 = vst [vmem:[#allocation8 + $0x10] sm:$0xff] %v402_v49 }
 0x158   :  { %v370_v50 = vpop.f32.mrf.mxu2 }
 0x159   :  { %v389_v51 = vpop.f32.mrf.mxu3 }
 0x15a   :  { %v390_v52 = vadd.f32 %v389_v51, %v370_v50 }
 0x15c   :  { %v403_v53 = vadd.f32 %v612_v38, %v390_v52 }
 0x15e   :  { %407 = vst [vmem:[#allocation8 + $0x18] sm:$0xff] %v403_v53 }
 0x15f   :  { %436 = dma.vmem_to_hbm [thread:$0]  %s429_s13, 512, %s431_s15, [#allocation4], %s716_s26, %s716_s26, %s717_s27  }
 0x160   :  { %713 = dma.done.wait [#allocation4], 512  }
 0x161   :  { %714 = vsyncadd [#allocation4], 4294966784 }
 0x162   :  { %441 = vsyncpa [#allocation3], 1 }
 0x163   :  { %442 = vsyncpa [#allocation6], 1 }
 0x164   :  { %443 = vsyncpa [#allocation4], 1 }

</bundles_post_ra>
